<compile_context>
chip_gen: v6e
topology: v6e:2x2x1
jax: 0.10.0
libtpu: 0.0.40
codegen_flags: <defaults>
</compile_context>

<pallas_src>
import jax
import jax.numpy as jnp
from jax.experimental import pallas as pl
from jax.experimental.pallas import tpu as pltpu


def se_kernel(x_ref, w1_ref, b1_ref, w2_ref, b2_ref, o_ref):
    # x_ref: (Nb, C, HW); w1_ref: (R, C); b1_ref: (R, 1); w2_ref: (C, R);
    # b2_ref: (C, 1); o_ref: (Nb, C, HW)
    nb, _, hw = x_ref.shape

    w1 = w1_ref[...]                                   # (R, C)
    w2 = w2_ref[...]                                   # (C, R)
    b1 = b1_ref[...].astype(jnp.float32)               # (R, 1)
    b2 = b2_ref[...].astype(jnp.float32)               # (C, 1)

    # Pooling vector, hoisted out of the per-image loop (built once per step).
    ones_hw = jnp.ones((hw, 1), dtype=x_ref.dtype)
    inv_hw = 1.0 / hw

    # Nb is a small static block size -> unroll over the images in the block.
    for n in range(nb):
        x_n = x_ref[n]                                 # (C, HW), native dtype

        # nn.AdaptiveAvgPool2d(1) as a thin MXU matmul.
        pooled = jnp.dot(x_n, ones_hw,
                         preferred_element_type=jnp.float32) * inv_hw   # (C, 1)

        # nn.Conv2d(C -> R, 1x1) + bias, then Swish.
        h = jnp.dot(w1, pooled, preferred_element_type=jnp.float32) + b1  # (R, 1)
        h = h * jax.nn.sigmoid(h)

        # nn.Conv2d(R -> C, 1x1) + bias, then Sigmoid.
        s = jnp.dot(w2, h, preferred_element_type=jnp.float32) + b2       # (C, 1)
        s = jax.nn.sigmoid(s)

        # Broadcast-multiply along lanes (HW); stays in the input dtype so a
        # bf16 activation path never materializes an f32 copy of x.
        o_ref[n] = (x_n * s.astype(x_n.dtype)).astype(o_ref.dtype)


def _pick_batch_block(n, c, hw, itemsize, vmem_budget_bytes):
    """Images per grid step: as many as fit the pipelined-VMEM budget, while
    keeping >= 2 grid steps when possible (so both v7x TensorCores get work)
    and dividing N exactly."""
    per_image = 4 * c * hw * itemsize           # in + out, each double-buffered
    nb = max(1, min(n, vmem_budget_bytes // max(per_image, 1)))
    if n >= 2:
        nb = min(nb, max(1, n // 2))
    while n % nb:
        nb -= 1
    return nb


def squeeze_excitation(x, w1, b1, w2, b2):
    """x: (N, C, H, W). w1: (R, C), b1: (R,), w2: (C, R), b2: (C,)."""
    N, C, H, W = x.shape
    R = w1.shape[0]
    HW = H * W

    x_flat = x.reshape(N, C, HW)
    b1_col = b1.reshape(R, 1)
    b2_col = b2.reshape(C, 1)

    # Conservative pipelined-block budget that fits every generation
    # (v7x has the smallest VMEM: 64 MiB physical / 32 MiB scoped default).
    block_budget_bytes = 16 * 1024 * 1024
    nb = _pick_batch_block(N, C, HW, x.dtype.itemsize, block_budget_bytes)
    grid = (N // nb,)

    out_flat = pl.pallas_call(
        se_kernel,
        out_shape=jax.ShapeDtypeStruct((N, C, HW), x.dtype),
        grid_spec=pltpu.PrefetchScalarGridSpec(
            num_scalar_prefetch=0,
            grid=grid,
            in_specs=[
                pl.BlockSpec((nb, C, HW), lambda i: (i, 0, 0)),
                pl.BlockSpec((R, C), lambda i: (0, 0)),   # squeeze conv weight
                pl.BlockSpec((R, 1), lambda i: (0, 0)),   # squeeze conv bias
                pl.BlockSpec((C, R), lambda i: (0, 0)),   # excite conv weight
                pl.BlockSpec((C, 1), lambda i: (0, 0)),   # excite conv bias
            ],
            out_specs=pl.BlockSpec((nb, C, HW), lambda i: (i, 0, 0)),
        ),
        compiler_params=pltpu.CompilerParams(
            dimension_semantics=("parallel",),
            # Explicit scoped-VMEM limit: above v5e's 16 MiB default, within
            # every generation's physical VMEM (64 MiB on v7x).
            vmem_limit_bytes=32 * 1024 * 1024,
        ),
    )(x_flat, w1, b1_col, w2, b2_col)

    return out_flat.reshape(N, C, H, W)


def _reference(x, w1, b1, w2, b2):
    # Pure-JAX reference of the PyTorch forward (for correctness check).
    pooled = jnp.mean(x, axis=(2, 3))                                       # (N, C)
    h = jnp.dot(pooled, w1.T, precision=jax.lax.Precision.HIGHEST) + b1     # (N, R)
    h = h * jax.nn.sigmoid(h)                                               # Swish
    s = jnp.dot(h, w2.T, precision=jax.lax.Precision.HIGHEST) + b2          # (N, C)
    s = jax.nn.sigmoid(s)
    return x * s[:, :, None, None]


if __name__ == "__main__":
    # Small shapes consistent with the module: batch=2, in_planes=32,
    # reduced_dim=8 (se ratio 0.25), spatial 16x16.
    N, C, R, H, W = 2, 32, 8, 16, 16

    key = jax.random.PRNGKey(0)
    kx, k1, kb1, k2, kb2 = jax.random.split(key, 5)
    x = jax.random.normal(kx, (N, C, H, W), dtype=jnp.float32)

    # Deterministic parameter init (Conv2d 1x1 weights squeezed to 2-D).
    w1 = 0.3 * jax.random.normal(k1, (R, C), dtype=jnp.float32)    # reduce conv
    b1 = 0.1 * jax.random.normal(kb1, (R,), dtype=jnp.float32)
    w2 = 0.3 * jax.random.normal(k2, (C, R), dtype=jnp.float32)    # expand conv
    b2 = 0.1 * jax.random.normal(kb2, (C,), dtype=jnp.float32)

    out = jax.block_until_ready(squeeze_excitation(x, w1, b1, w2, b2))
    ref = _reference(x, w1, b1, w2, b2)

    assert out.shape == (N, C, H, W)
    # Tolerance allows for MXU f32 pass behaviour vs. the XLA reference while
    # still catching any real math/layout bug (those show up at O(0.1)+).
    assert jnp.allclose(out, ref, atol=1e-3, rtol=1e-3), "mismatch vs reference"

    print("KERNEL_OK")
</pallas_src>

<mosaic_0001>
module attributes {stable_mosaic.version = 11 : i64} {
  func.func @se_kernel(%arg0: i32, %arg1: memref<1x32x256xf32, #tpu.memory_space<vmem>>, %arg2: memref<8x32xf32, #tpu.memory_space<vmem>>, %arg3: memref<8x1xf32, #tpu.memory_space<vmem>>, %arg4: memref<32x8xf32, #tpu.memory_space<vmem>>, %arg5: memref<32x1xf32, #tpu.memory_space<vmem>>, %arg6: memref<1x32x256xf32, #tpu.memory_space<vmem>>) attributes {dimension_semantics = [#tpu.dimension_semantics<parallel>], iteration_bounds = array<i64: 2>, scalar_prefetch = 0 : i64, scratch_operands = 0 : i64, tpu.core_type = #tpu.core_type<tc>, window_params = [{transform_indices = @transform_0, window_bounds = array<i64: 1, 32, 256>}, {pipeline_mode = #tpu.pipeline_mode<synchronous>, transform_indices = @transform_1, window_bounds = array<i64: 8, 32>}, {pipeline_mode = #tpu.pipeline_mode<synchronous>, transform_indices = @transform_2, window_bounds = array<i64: 8, 1>}, {pipeline_mode = #tpu.pipeline_mode<synchronous>, transform_indices = @transform_3, window_bounds = array<i64: 32, 8>}, {pipeline_mode = #tpu.pipeline_mode<synchronous>, transform_indices = @transform_4, window_bounds = array<i64: 32, 1>}, {transform_indices = @transform_5, window_bounds = array<i64: 1, 32, 256>}]} {
    %c0 = arith.constant 0 : index
    %c0_0 = arith.constant 0 : index
    %0 = vector.load %arg2[%c0, %c0_0] : memref<8x32xf32, #tpu.memory_space<vmem>>, vector<8x32xf32>
    %c0_1 = arith.constant 0 : index
    %c0_2 = arith.constant 0 : index
    %1 = vector.load %arg4[%c0_1, %c0_2] : memref<32x8xf32, #tpu.memory_space<vmem>>, vector<32x8xf32>
    %c0_3 = arith.constant 0 : index
    %c0_4 = arith.constant 0 : index
    %2 = vector.load %arg3[%c0_3, %c0_4] : memref<8x1xf32, #tpu.memory_space<vmem>>, vector<8x1xf32>
    %c0_5 = arith.constant 0 : index
    %c0_6 = arith.constant 0 : index
    %3 = vector.load %arg5[%c0_5, %c0_6] : memref<32x1xf32, #tpu.memory_space<vmem>>, vector<32x1xf32>
    %cst = arith.constant 1.000000e+00 : f32
    %4 = vector.broadcast %cst : f32 to vector<256x1xf32>
    %c0_7 = arith.constant 0 : index
    %c0_8 = arith.constant 0 : index
    %c0_9 = arith.constant 0 : index
    %5 = vector.load %arg1[%c0_7, %c0_8, %c0_9] : memref<1x32x256xf32, #tpu.memory_space<vmem>>, vector<1x32x256xf32>
    %6 = vector.shape_cast %5 : vector<1x32x256xf32> to vector<32x256xf32>
    %cst_10 = arith.constant dense<0.000000e+00> : vector<32x1xf32>
    %7 = tpu.matmul %6, %4, %cst_10 {dimension_numbers = #tpu.dot_dimension_numbers<[1], [0], [0], [1], [0, 0, 1, 1], [], []>} : vector<32x256xf32>, vector<256x1xf32>, vector<32x1xf32> -> vector<32x1xf32>
    %cst_11 = arith.constant 3.906250e-03 : f32
    %8 = vector.broadcast %cst_11 : f32 to vector<32x1xf32>
    %9 = arith.mulf %7, %8 : vector<32x1xf32>
    %cst_12 = arith.constant dense<0.000000e+00> : vector<8x1xf32>
    %10 = tpu.matmul %0, %9, %cst_12 {dimension_numbers = #tpu.dot_dimension_numbers<[1], [0], [0], [1], [0, 0, 1, 1], [], []>} : vector<8x32xf32>, vector<32x1xf32>, vector<8x1xf32> -> vector<8x1xf32>
    %11 = arith.addf %10, %2 : vector<8x1xf32>
    %12 = arith.negf %11 : vector<8x1xf32>
    %13 = math.exp %12 : vector<8x1xf32>
    %cst_13 = arith.constant 1.000000e+00 : f32
    %14 = vector.broadcast %cst_13 : f32 to vector<8x1xf32>
    %15 = arith.addf %14, %13 : vector<8x1xf32>
    %16 = arith.divf %14, %15 : vector<8x1xf32>
    %17 = arith.mulf %11, %16 : vector<8x1xf32>
    %cst_14 = arith.constant dense<0.000000e+00> : vector<32x1xf32>
    %18 = tpu.matmul %1, %17, %cst_14 {dimension_numbers = #tpu.dot_dimension_numbers<[1], [0], [0], [1], [0, 0, 1, 1], [], []>} : vector<32x8xf32>, vector<8x1xf32>, vector<32x1xf32> -> vector<32x1xf32>
    %19 = arith.addf %18, %3 : vector<32x1xf32>
    %20 = arith.negf %19 : vector<32x1xf32>
    %21 = math.exp %20 : vector<32x1xf32>
    %cst_15 = arith.constant 1.000000e+00 : f32
    %22 = vector.broadcast %cst_15 : f32 to vector<32x1xf32>
    %23 = arith.addf %22, %21 : vector<32x1xf32>
    %24 = arith.divf %22, %23 : vector<32x1xf32>
    %25 = vector.broadcast %24 : vector<32x1xf32> to vector<32x256xf32>
    %26 = arith.mulf %6, %25 : vector<32x256xf32>
    %c0_16 = arith.constant 0 : index
    %c0_17 = arith.constant 0 : index
    %c0_18 = arith.constant 0 : index
    %27 = vector.load %arg6[%c0_16, %c0_17, %c0_18] : memref<1x32x256xf32, #tpu.memory_space<vmem>>, vector<1x32x256xf32>
    %28 = vector.shape_cast %27 : vector<1x32x256xf32> to vector<32x256xf32>
    %29 = vector.shape_cast %26 : vector<32x256xf32> to vector<1x32x256xf32>
    tpu.vector_store %arg6[%c0_16, %c0_17, %c0_18], %29 {strides = array<i32>} : memref<1x32x256xf32, #tpu.memory_space<vmem>>, vector<1x32x256xf32>,
    return
  }
  func.func @transform_0(%arg0: i32) -> (i32, i32, i32) {
    %c0_i32 = arith.constant 0 : i32
    %c0_i32_0 = arith.constant 0 : i32
    %c0_i32_1 = arith.constant 0 : i32
    return %arg0, %c0_i32, %c0_i32_0 : i32, i32, i32
  }
  func.func @transform_1(%arg0: i32) -> (i32, i32) {
    %c0_i32 = arith.constant 0 : i32
    %c0_i32_0 = arith.constant 0 : i32
    %c0_i32_1 = arith.constant 0 : i32
    return %c0_i32, %c0_i32_0 : i32, i32
  }
  func.func @transform_2(%arg0: i32) -> (i32, i32) {
    %c0_i32 = arith.constant 0 : i32
    %c0_i32_0 = arith.constant 0 : i32
    %c0_i32_1 = arith.constant 0 : i32
    return %c0_i32, %c0_i32_0 : i32, i32
  }
  func.func @transform_3(%arg0: i32) -> (i32, i32) {
    %c0_i32 = arith.constant 0 : i32
    %c0_i32_0 = arith.constant 0 : i32
    %c0_i32_1 = arith.constant 0 : i32
    return %c0_i32, %c0_i32_0 : i32, i32
  }
  func.func @transform_4(%arg0: i32) -> (i32, i32) {
    %c0_i32 = arith.constant 0 : i32
    %c0_i32_0 = arith.constant 0 : i32
    %c0_i32_1 = arith.constant 0 : i32
    return %c0_i32, %c0_i32_0 : i32, i32
  }
  func.func @transform_5(%arg0: i32) -> (i32, i32, i32) {
    %c0_i32 = arith.constant 0 : i32
    %c0_i32_0 = arith.constant 0 : i32
    %c0_i32_1 = arith.constant 0 : i32
    return %arg0, %c0_i32, %c0_i32_0 : i32, i32, i32
  }
}

</mosaic_0001>

<bundles_post_ra>
// kernel: tpu_custom_call.1
= control target key start
LH: loop header
LB: loop body
LE: loop exit
PB: predicated region body
PF: predicated region fallthrough
CT: control target
= control target key end

     0   :  { %10 = vsyncpa [#allocation3], 0  ;;  %s1219_s0 = inlined_call_operand.hbm [shape: f32[2,32,256], index: 0, kind: input, shape index: {}]   ;;  %s1220_s1 = inlined_call_operand.vmem [shape: f32[8,32], index: 1, kind: input, shape index: {}]   ;;  %s1221_s2 = inlined_call_operand.vmem [shape: f32[8,1], index: 2, kind: input, shape index: {}]   ;;  %s1222_s3 = inlined_call_operand.vmem [shape: f32[32,8], index: 3, kind: input, shape index: {}]   ;;  %s1223_s4 = inlined_call_operand.vmem [shape: f32[32,1], index: 4, kind: input, shape index: {}]   ;;  %s1224_s5 = inlined_call_operand.hbm [shape: f32[2,32,256], index: 5, kind: output, shape index: {}]  }
   0x1   :  { %12 = vsyncpa [#allocation3 + $0x1], 0 }
   0x2   :  { %13 = vsyncpa [#allocation4], 0 }
   0x3   :  { %15 = vsyncpa [#allocation4 + $0x1], 0  ;;  %s985_s18 = smov 0   ;;  %s987_s19 = smov 0  }
   0x4   :  { %s989_s20 = smov 0   ;;  %s991_s21 = smov 0  }
   0x5 LB: > { %s1006_s22 = sadd.s32 4294967295, %s943_s21   ;;  %s676_s23 = sadd.s32 4294967294, %s943_s21   ;;  %s943_s21 = sphi %s991_s21, %s1239_s21   ;;  %s939_s20 = sphi %s989_s20, %s1238_s20   ;;  %s935_s19 = sphi %s987_s19, %s1237_s19   ;;  %s931_s18 = sphi %s985_s18, %s1236_s18  }
   0x6   : > { %s1010_s24 = sadd.s32 1, %s943_s21   ;;  %s28_s25 = sadd.s32 1, %s939_s20 }
   0x7   : > { %s25_s26 = ssub.s32 %s943_s21, %s1010_s24  ;;  %p35_p0 = scmp.ne.s32.totalorder %s939_s20, %s935_s19 }
   0x8   : > { %p26_p1 = scmp.eq.s32.totalorder %s25_s26, 0  ;;  %p36_p2 = scmp.eq.s32.totalorder %s943_s21, 0 }
   0x9   : > { %p41_p3 = scmp.ne.s32.totalorder %s935_s19, %s931_s18  ;;  %p42_p4 = scmp.eq.s32.totalorder %s1006_s22, 0 }
   0xa   : > { %s1022_s27 = scalar_select %p26_p1, %s939_s20, %s28_s25  }
   0xb   : > { %p1024_p5 = por %p36_p2, %p35_p0  ;;  %p1028_p6 = por %p42_p4, %p41_p3 }
   0xc   : > { %p149_p7 = scmp.eq.s32.totalorder %s1006_s22, 1  ;;  %p155_p8 = scmp.eq.s32.totalorder %s676_s23, 1 }
   0xd   : > { %s1228_s29 = scalar_select %p1028_p6, 1, 0 }
   0xe   : > { %p787_p10 = scmp.lt.s32.totalorder %s943_s21, 2  ;;  %p1035_p11 = por %p149_p7, %p35_p0 }
   0xf   : > { %p1039_p12 = por %p155_p8, %p41_p3  ;;  %s187_s7 = sand.u32 1, %s939_s20  }
  0x10   : > { %s1229_s30 = scalar_select %p1035_p11, 1, 0 }
  0x11   : > { %s1230_s6 = scalar_select %p1039_p12, 1, 0 }
  0x12   : > { %s700_s8 = sshll.u32 %s943_s21, 10  ;;  %s679_s9 = sshll.u32 %s187_s7, 6 }
  0x13   : > { %s1048_s12 = scalar_lea.hbm %s1219_s0, %s700_s8  ;;  %s191_s13 = scalar_lea.vmem [#allocation2], %s679_s9 }
  0x14   : > { %s198_s14 = sshll.u32 %s191_s13, 4  ;;  %p1052_p13 = pnand %p787_p10, %p1024_p5  ;;  %s1056_s14 = int_to_ptr.vmem [resolvable:$true] %s198_s14 }
  0x15   : > { %s1058_s16 = scalar_lea.sflag [#allocation3], %s187_s7  ;;  %s851_s17 = scalar_lea.hbm %s1048_s12, 1024 }
  0x16   : > { %p852_p0 = scmp.ne.s32.totalorder %s1048_s12, %s851_s17  ;;  %p853_p1 = pneg %p1052_p13 }
  0x17   : > { %s856_s26 = scalar_lea.hbm %s1219_s0, 2048  ;;  %p857_p4 = scmp.lt.s32.totalorder %s1048_s12, %s1219_s0 }
  0x18   : > { %p854_p2 = pnand %p853_p1, %p852_p0  ;;  %p858_p5 = scmp.lt.s32.totalorder %s856_s26, %s851_s17 }
  0x1a   : > { %p855_p3 = pneg %p854_p2  ;;  %p859_p7 = por %p858_p5, %p857_p4 }
  0x1c   : > { %p860_p8 = pnand %p859_p7, %p855_p3 }
  0x1e   : > { %863 = shalt.err (!%p860_p8)
}
  0x1f   : > { %s864_s7 = scalar_lea.vmem %s1056_s14, 1024  ;;  %s945_s9 = smov [#allocation2]  }
  0x20   : > { %p865_p10 = scmp.ne.s32.totalorder %s1056_s14, %s864_s7  ;;  %s869_s10 = sshll.u32 %s945_s9, 4  ;;  %s870_s10 = int_to_ptr.vmem [resolvable:$false] %s869_s10 }
  0x21   : > { %s871_s11 = scalar_lea.vmem %s870_s10, 2048  ;;  %p872_p2 = scmp.lt.s32.totalorder %s1056_s14, %s870_s10 }
  0x22   : > { %p867_p9 = pnand %p865_p10, %p853_p1  ;;  %p873_p12 = scmp.lt.s32.totalorder %s871_s11, %s864_s7 }
  0x24   : > { %p868_p0 = pneg %p867_p9  ;;  %p874_p11 = por %p873_p12, %p872_p2 }
  0x26   : > { %p875_p6 = pnand %p874_p11, %p868_p0 }
  0x28   : > { %878 = shalt.err (!%p875_p6)
}
  0x29   : > { %s946_s13 = smov 256   ;;  %s947_s17 = smov 16  }
  0x2a   : > { %782 = dma.hbm_to_vmem [thread:$0]  (!%p1052_p13), %s1048_s12, 1024, %s1056_s14, %s1058_s16, %s946_s13, %s946_s13, %s947_s17  }
  0x2b   : > { %p682_p9 = scmp.ge.s32.totalorder %s943_s21, 1  ;;  %p206_p1 = scmp.lt.s32.totalorder %s943_s21, 3 }
  0x2d   : > { %p207_p3 = pnand %p682_p9, %p206_p1 }
  0x2e   : > { %s1082_s23 = sand.u32 (!%p207_p3), 1, %s935_s19   ;;  %p1232_p6 = scmp.ne.s32.totalorder (!%p207_p3), %s1228_s29, 0 }
  0x2f   : > { %210 = sbr.rel (%p207_p3) target bundleno = 912 (0x390), region = 40  ;;  %s683_s25 = sshll.u32 (!%p207_p3), %s1082_s23, 6 }
  0x30   : > { %s213_s26 = scalar_lea.sflag (!%p207_p3), [#allocation3], %s1082_s23  ;;  %s1088_s28 = scalar_lea.vmem (!%p207_p3), [#allocation2], %s683_s25 }
  0x34   : > { %922 = dma.done.wait (%p1232_p6), %s213_s26, 1024  }
  0x35   : > { %924 = vsyncadd (%p1232_p6), %s213_s26, 4294966272  ;;  %v948_v0 = vmov 1.0   ;;  %v1095_v1 = vld [vmem:[%s1088_s28 + $0x8] sm:$0xff]  ;;  %v1099_v2 = vld [vmem:[%s1088_s28] sm:$0xff]  ;;  %v949_v9 = vmov 0.0   ;;  %vm950_vm0 = vmmov 0  }
  0x36   : > { %702 = vmatprep.subr.mxu0 %v948_v0  ;;  %325 = vmatprep.mubr.f32.mxu0 %v1095_v1  ;;  %v1102_v3 = vld [vmem:[%s1088_s28 + $0x18] sm:$0xff]  ;;  %v1107_v4 = vld [vmem:[%s1088_s28 + $0x10] sm:$0xff]  ;;  %v1110_v5 = vld [vmem:[%s1088_s28 + $0x28] sm:$0xff]  ;;  %vm350_vm1 = vcmask 261120   ;;  %vm431_vm2 = vcmask 64512   ;;  %v951_v40 = vmov 0  }
  0x37   : > { %703 = vmatpush3.msra.mxu0 %v948_v0  ;;  %v1115_v6 = vld [vmem:[%s1088_s28 + $0x20] sm:$0xff]  ;;  %v1118_v7 = vld [vmem:[%s1088_s28 + $0x38] sm:$0xff]  ;;  %v1123_v8 = vld [vmem:[%s1088_s28 + $0x30] sm:$0xff]  ;;  %756 = vmatprep.subr.mxu1 %v949_v9  ;;  %s242_s7 = scalar_lea.vmem [#allocation5], %s683_s25  ;;  %s701_s10 = sshll.u32 %s1006_s22, 10 }
  0x38   : > { %704 = vmatprep.subr.mxu0 %v948_v0  ;;  %764 = vmatprep.mubr.msk.f32.mxu1 %vm950_vm0, %v949_v9  ;;  %v243_v26 = vld [vmem:[%s1220_s1] sm:$0xff]  ;;  %v245_v37 = vld [vmem:[%s1222_s3 + $0x8] sm:$0xff]  ;;  %v246_v38 = vld [vmem:[%s1222_s3 + $0x10] sm:$0xff]  ;;  %s603_s9 = sshll.u32 %s242_s7, 4  ;;  %s1174_s13 = scalar_lea.hbm %s1224_s5, %s701_s10  ;;  %s1169_s9 = int_to_ptr.vmem [resolvable:$true] %s603_s9 }
  0x39   : > { %705 = vmatpush3.msra.mxu0 %v948_v0  ;;  %v244_v27 = vld [vmem:[%s1222_s3] sm:$0xff]  ;;  %v247_v39 = vld [vmem:[%s1222_s3 + $0x18] sm:$0xff]  ;;  %829 = vset.pattern.permute.xlu0 %v951_v40  ;;  %v250_v41 = vld [vmem:[%s1223_s4 + $0x8] sm:$0xff]  ;;  %s590_s22 = scalar_lea.sflag [#allocation4], %s1082_s23  ;;  %s879_s17 = scalar_lea.vmem %s1169_s9, 1024 }
  0x3a   : > { %706 = vmatprep.subr.mxu0 %v948_v0  ;;  %v248_v28 = vld [vmem:[%s1221_s2] sm:$0xff]  ;;  %830 = vset.pattern.permute.xlu1 %v951_v40  ;;  %v252_v46 = vld [vmem:[%s1223_s4 + $0x18] sm:$0xff]  ;;  %v251_v50 = vld [vmem:[%s1223_s4 + $0x10] sm:$0xff]  ;;  %p880_p11 = scmp.ne.s32.totalorder %s1169_s9, %s879_s17  ;;  %p1233_p12 = scmp.ne.s32.totalorder %s1229_s30, 0 }
  0x3b   : > { %707 = vmatpush3.msra.mxu0 %v948_v0  ;;  %v249_v43 = vld [vmem:[%s1223_s4] sm:$0xff]  ;;  %s952_s26 = smov [#allocation5]  }
  0x3c   : > { %708 = vmatprep.subr.mxu0 %v948_v0  ;;  %p881_p13 = pnand %p880_p11, %p1233_p12  ;;  %s883_s28 = sshll.u32 %s952_s26, 4  ;;  %s884_s28 = int_to_ptr.vmem [resolvable:$false] %s883_s28 }
  0x3d   : > { %709 = vmatpush3.msra.mxu0 %v948_v0  ;;  %s885_s29 = scalar_lea.vmem %s884_s28, 2048  ;;  %p886_p5 = scmp.lt.s32.totalorder %s1169_s9, %s884_s28 }
  0x3e   : > { %710 = vmatprep.subr.mxu0 %v948_v0  ;;  %p882_p4 = pneg %p881_p13  ;;  %p887_p7 = scmp.lt.s32.totalorder %s885_s29, %s879_s17 }
  0x3f   : > { %711 = vmatpush3.msra.mxu0 %v948_v0 }
  0x40   : > { %712 = vmatprep.subr.mxu0 %v948_v0  ;;  %p888_p8 = por %p887_p7, %p886_p5 }
  0x41   : > { %713 = vmatpush3.msra.mxu0 %v948_v0 }
  0x42   : > { %714 = vmatprep.subr.mxu0 %v948_v0  ;;  %p889_p10 = pnand %p888_p8, %p882_p4 }
  0x43   : > { %715 = vmatpush3.msra.mxu0 %v948_v0 }
  0x44   : > { %716 = vmatprep.subr.mxu0 %v948_v0 }
  0x45   : > { %717 = vmatpush3.msra.mxu0 %v948_v0 }
  0x46   : > { %718 = vmatprep.subr.mxu0 %v948_v0 }
  0x47   : > { %719 = vmatpush3.msra.mxu0 %v948_v0 }
  0x48   : > { %720 = vmatprep.subr.mxu0 %v948_v0 }
  0x49   : > { %721 = vmatpush3.msra.mxu0 %v948_v0 }
  0x4a   : > { %722 = vmatprep.subr.mxu0 %v948_v0 }
  0x4b   : > { %723 = vmatpush3.msra.mxu0 %v948_v0 }
  0x4c   : > { %724 = vmatprep.subr.mxu0 %v948_v0 }
  0x4d   : > { %725 = vmatpush3.msra.mxu0 %v948_v0 }
  0x4e   : > { %726 = vmatprep.subr.mxu0 %v948_v0 }
  0x4f   : > { %727 = vmatpush3.msra.mxu0 %v948_v0 }
  0x50   : > { %728 = vmatprep.subr.mxu0 %v948_v0 }
  0x51   : > { %729 = vmatpush3.msra.mxu0 %v948_v0 }
  0x52   : > { %730 = vmatprep.subr.mxu0 %v948_v0 }
  0x53   : > { %731 = vmatpush3.msra.mxu0 %v948_v0 }
  0x54   : > { %732 = vmatprep.subr.mxu0 %v948_v0 }
  0x55   : > { %733 = vmatpush3.msra.mxu0 %v948_v0 }
  0x56   : > { %326 = vmatmul.mubr.f32.vlgmr.msra.gmra.mxu0 %v1099_v2 }
  0x57   : > { %330 = vmatprep.mubr.f32.mxu0 %v1102_v3 }
  0x5a   : > { %331 = vmatmul.mubr.f32.gmra.mxu0 %v1107_v4 }
  0x5b   : > { %335 = vmatprep.mubr.f32.mxu0 %v1110_v5 }
  0x5e   : > { %336 = vmatmul.mubr.f32.gmra.mxu0 %v1115_v6 }
  0x5f   : > { %340 = vmatprep.mubr.f32.mxu0 %v1118_v7 }
  0x62   : > { %341 = vmatmul.mubr.f32.gmra.mxu0 %v1123_v8 }
 0x116   : > { %v734_v10 = vpop.f32.mrf.mxu0 }
 0x118   : > { %v735_v11 = vpop.f32.mrf.mxu0 }
 0x119   : > { %v736_v22 = vadd.f32 %v735_v11, %v734_v10 }
 0x11a   : > { %v737_v12 = vpop.f32.mrf.mxu0 }
 0x11b   : > { %v346_v25 = vmul.f32 0.00390625, %v736_v22 }
 0x11c   : > { %v738_v13 = vpop.f32.mrf.mxu0 }
 0x11d   : > { %v739_v20 = vadd.f32 %v738_v13, %v737_v12 }
 0x11e   : > { %v740_v14 = vpop.f32.mrf.mxu0 }
 0x11f   : > { %v347_v24 = vmul.f32 0.00390625, %v739_v20 }
 0x120   : > { %v741_v15 = vpop.f32.mrf.mxu0 }
 0x121   : > { %v742_v18 = vadd.f32 %v741_v15, %v740_v14 }
 0x122   : > { %v743_v16 = vpop.f32.mrf.mxu0 }
 0x123   : > { %v348_v23 = vmul.f32 0.00390625, %v742_v18 }
 0x124   : > { %v744_v17 = vpop.f32.mrf.mxu0 }
 0x125   : > { %v745_v19 = vadd.f32 %v744_v17, %v743_v16 }
 0x127   : > { %v349_v21 = vmul.f32 0.00390625, %v745_v19 }
 0x129   : > { %757 = vmatpush3.msra.mxu1 %v349_v21 }
 0x12a   : > { %758 = vmatprep.subr.mxu1 %v949_v9 }
 0x12b   : > { %759 = vmatpush3.msra.mxu1 %v348_v23 }
 0x12c   : > { %760 = vmatprep.subr.mxu1 %v949_v9 }
 0x12d   : > { %761 = vmatpush3.msra.mxu1 %v347_v24 }
 0x12e   : > { %762 = vmatprep.subr.mxu1 %v949_v9 }
 0x12f   : > { %763 = vmatpush3.msra.mxu1 %v346_v25 }
 0x130   : > { %765 = vmatmul.mubr.msk.f32.vlgmr.msra.gmra.mxu1 %vm350_vm1, %v243_v26 }
 0x131   : > { %769 = vmatprep.mubr.msk.f32.mxu1 %vm431_vm2, %v244_v27 }
 0x1f0   : > { %v420_v29 = vpop.f32.mrf.mxu1 }
 0x1f1   : > { %v421_v30 = vadd.f32 %v420_v29, %v248_v28 }
 0x1f2   : > { %v766_v31 = vpop.f32.mrf.mxu1 }
 0x1f3   : > { %v686_v32 = vmul.f32 -1.442695, %v421_v30 }
 0x1f5   : > { %831 = vpow2.f32 %v686_v32 }
 0x202   : > { %v832_v33 = vpop.eup %831 }
 0x203   : > { %v427_v34 = vadd.f32 1.0, %v832_v33 }
 0x205   : > { %833 = vrcp.f32 %v427_v34 }
 0x212   : > { %v834_v35 = vpop.eup %833 }
 0x213   : > { %v430_v36 = vmul.f32 %v834_v35, %v421_v30 }
 0x215   : > { %767 = vmatprep.subr.mxu1 %v430_v36 }
 0x216   : > { %768 = vmatpush3.msra.mxu1 %v430_v36 }
 0x217   : > { %770 = vmatmul.mubr.msk.f32.vlgmr.msra.gmra.mxu1 %vm431_vm2, %v245_v37 }
 0x218   : > { %772 = vmatprep.mubr.msk.f32.mxu1 %vm431_vm2, %v246_v38 }
 0x21b   : > { %773 = vmatmul.mubr.msk.f32.gmra.mxu1 %vm431_vm2, %v247_v39 }
 0x2d7   : > { %v771_v42 = vpop.f32.mrf.mxu1 }
 0x2d8   : > { %v516_v44 = vadd.f32 %v771_v42, %v250_v41 }
 0x2d9   : > { %v510_v45 = vpop.f32.mrf.mxu1 }
 0x2da   : > { %v692_v47 = vmul.f32 -1.442695, %v516_v44  ;;  %v511_v48 = vadd.f32 %v510_v45, %v249_v43 }
 0x2db   : > { %v774_v49 = vpop.f32.mrf.mxu1 }
 0x2dc   : > { %v691_v51 = vmul.f32 -1.442695, %v511_v48  ;;  %v526_v52 = vadd.f32 %v774_v49, %v252_v46  ;;  %835 = vpow2.f32 %v692_v47 }
 0x2dd   : > { %v520_v53 = vpop.f32.mrf.mxu1 }
 0x2de   : > { %837 = vpow2.f32 %v691_v51  ;;  %v694_v54 = vmul.f32 -1.442695, %v526_v52  ;;  %v521_v55 = vadd.f32 %v520_v53, %v251_v50 }
 0x2e0   : > { %v693_v56 = vmul.f32 -1.442695, %v521_v55  ;;  %839 = vpow2.f32 %v694_v54 }
 0x2e2   : > { %841 = vpow2.f32 %v693_v56 }
 0x2e9   : > { %v836_v57 = vpop.eup %835 }
 0x2ea   : > { %v542_v60 = vadd.f32 1.0, %v836_v57 }
 0x2eb   : > { %v838_v58 = vpop.eup %837 }
 0x2ec   : > { %v541_v59 = vadd.f32 1.0, %v838_v58 }
 0x2ed   : > { %v840_v61 = vpop.eup %839 }
 0x2ee   : > { %843 = vrcp.f32 %v541_v59  ;;  %v544_v0 = vadd.f32 1.0, %v840_v61 }
 0x2ef   : > { %v842_v62 = vpop.eup %841  ;;  %845 = vrcp.f32 %v542_v60 }
 0x2f0   : > { %v543_v63 = vadd.f32 1.0, %v842_v62 }
 0x2f2   : > { %847 = vrcp.f32 %v543_v63 }
 0x2f3   : > { %849 = vrcp.f32 %v544_v0 }
 0x2fb   : > { %v844_v9 = vpop.eup %843 }
 0x2fc   : > { %555 = vperm.xlu0 %829, %v844_v9   ;;  %v846_v10 = vpop.eup %845 }
 0x2ff   : > { %v848_v11 = vpop.eup %847 }
 0x300   : > { %565 = vperm.xlu1 %830, %v848_v11   ;;  %560 = vperm.xlu0 %829, %v846_v10   ;;  %v850_v12 = vpop.eup %849 }
 0x304   : > { %570 = vperm.xlu1 %830, %v850_v12  }
 0x377   : > { %v556_v13 = vpop.permute.xlu0 %555 }
 0x378   : > { %v573_v14 = vmul.f32 %v556_v13, %v1099_v2  ;;  %v574_v15 = vmul.f32 %v556_v13, %v1095_v1 }
 0x37a   : > { %581 = vst [vmem:[%s242_s7] sm:$0xff] %v573_v14  ;;  %582 = vst [vmem:[%s242_s7 + $0x8] sm:$0xff] %v574_v15 }
 0x37b   : > { %v566_v16 = vpop.permute.xlu1 %565  ;;  %v561_v17 = vpop.permute.xlu0 %560 }
 0x37c   : > { %v577_v18 = vmul.f32 %v566_v16, %v1115_v6  ;;  %v578_v19 = vmul.f32 %v566_v16, %v1110_v5  ;;  %v575_v20 = vmul.f32 %v561_v17, %v1107_v4  ;;  %v576_v21 = vmul.f32 %v561_v17, %v1102_v3 }
 0x37e   : > { %585 = vst [vmem:[%s242_s7 + $0x20] sm:$0xff] %v577_v18  ;;  %586 = vst [vmem:[%s242_s7 + $0x28] sm:$0xff] %v578_v19 }
 0x37f   : > { %583 = vst [vmem:[%s242_s7 + $0x10] sm:$0xff] %v575_v20  ;;  %584 = vst [vmem:[%s242_s7 + $0x18] sm:$0xff] %v576_v21  ;;  %v571_v1 = vpop.permute.xlu1 %570 }
 0x380   : > { %v579_v2 = vmul.f32 %v571_v1, %v1123_v8  ;;  %v580_v3 = vmul.f32 %v571_v1, %v1118_v7 }
 0x382   : > { %587 = vst [vmem:[%s242_s7 + $0x30] sm:$0xff] %v579_v2  ;;  %588 = vst [vmem:[%s242_s7 + $0x38] sm:$0xff] %v580_v3 }
 0x383   : > { %892 = shalt.err (!%p889_p10)
}
 0x384   : > { %s893_s12 = scalar_lea.hbm %s1174_s13, 1024  ;;  %s897_s16 = scalar_lea.hbm %s1224_s5, 2048 }
 0x385   : > { %p894_p0 = scmp.ne.s32.totalorder %s1174_s13, %s893_s12  ;;  %p898_p1 = scmp.lt.s32.totalorder %s1174_s13, %s1224_s5 }
 0x386   : > { %p899_p3 = scmp.lt.s32.totalorder %s897_s16, %s893_s12 }
 0x387   : > { %p895_p2 = pnand %p894_p0, %p1233_p12 }
 0x388   : > { %p900_p6 = por %p899_p3, %p898_p1 }
 0x389   : > { %p896_p9 = pneg %p895_p2 }
 0x38b   : > { %p901_p11 = pnand %p900_p6, %p896_p9 }
 0x38d   : > { %904 = shalt.err (!%p901_p11)
}
 0x38e   : > { %s953_s10 = smov 256   ;;  %s954_s25 = smov 16  }
 0x38f   : > { %777 = dma.vmem_to_hbm [thread:$0]  (%p1233_p12), %s1169_s9, 1024, %s1174_s13, %s590_s22, %s953_s10, %s953_s10, %s954_s25  }
 0x390 PF: > { %s618_s11 = sand.u32 1, %s931_s18   ;;  %p1234_p13 = scmp.ne.s32.totalorder %s1230_s6, 0 }
 0x391   : > { %p1235_p4 = scmp.ge.s32.totalorder %s943_s21, 2  ;;  %s619_s17 = scalar_lea.sflag [#allocation4], %s618_s11 }
 0x393   : > { %p784_p5 = pnand %p1235_p4, %p1234_p13 }
 0x395   : > { %p785_p7 = pneg %p784_p5 }
 0x397   : > { %926 = dma.done.wait (%p785_p7), %s619_s17, 1024  }
 0x398   : > { %928 = vsyncadd (%p785_p7), %s619_s17, 4294966272  ;;  %p18_p8 = scmp.ge.s32.totalorder %s1010_s24, 4   ;;  %s1236_s18 = smov %s935_s19 }
 0x399   : > { %s1237_s19 = smov %s939_s20  ;;  %s1238_s20 = smov %s1022_s27 }
 0x39a   : > { %s1239_s21 = smov %s1010_s24  ;;  %20 = sbr.rel (!%p18_p8) target bundleno = 5 (0x5), region = 85 }
 0x39f   :  { %624 = vsyncpa [#allocation3], 1 }
 0x3a0   :  { %626 = vsyncpa [#allocation3 + $0x1], 1 }
 0x3a1   :  { %627 = vsyncpa [#allocation4], 1 }
 0x3a2   :  { %629 = vsyncpa [#allocation4 + $0x1], 1 }

</bundles_post_ra>
